<compile_context>
chip_gen: v7x
topology: tpu7x:2x2x1
jax: 0.10.0
libtpu: 0.0.40
codegen_flags: <defaults>
</compile_context>

<pallas_src>
import jax
import jax.numpy as jnp
from jax.experimental import pallas as pl
from jax.experimental.pallas import tpu as pltpu


def _sigmoid_tanh(z):
    # sigmoid(z) == 0.5 * (tanh(z/2) + 1): one EUP transcendental per element.
    return 0.5 * (jnp.tanh(0.5 * z) + 1.0)


def _ae_classifier_kernel(x_ref, w0_ref, b0_ref, w1_ref, b1_ref,
                          wc_ref, bc_ref, out_ref):
    # x arrives f32; cast the tile to bf16 in-kernel (VPU, hidden under MXU).
    x_bf = x_ref[...].astype(jnp.bfloat16)

    # Encoder layer 0: Linear + Sigmoid. bf16 MXU operands, f32 accumulate.
    z0 = jnp.dot(x_bf, w0_ref[...], preferred_element_type=jnp.float32)
    h0 = _sigmoid_tanh(z0 + b0_ref[...])

    # Encoder layer 1: Linear + Sigmoid.
    z1 = jnp.dot(h0.astype(jnp.bfloat16), w1_ref[...],
                 preferred_element_type=jnp.float32)
    h1 = _sigmoid_tanh(z1 + b1_ref[...])

    # Classifier Linear + LogSoftmax over the class (lane) axis.
    logits = jnp.dot(h1.astype(jnp.bfloat16), wc_ref[...],
                     preferred_element_type=jnp.float32) + bc_ref[...]
    m = jnp.max(logits, axis=-1, keepdims=True)
    z = logits - m
    lse = jnp.log(jnp.sum(jnp.exp(z), axis=-1, keepdims=True))
    out_ref[...] = (z - lse).astype(out_ref.dtype)


def _default_batch_tile(B):
    # As large as is useful (cap 1024; sweep 1024-2048 if B is huge), multiple
    # of 8 (f32 sublanes), while keeping grid >= 2 whenever B permits so the
    # batch is split across v7x's two TensorCores and DMA overlaps compute.
    if B <= 8:
        return B
    tb = min(1024, B // 2)          # guarantees grid >= 2 for B >= 16
    return max(8, (tb // 8) * 8)


def prepare_params(params):
    """One-time weight prep (hoist out of the per-call path).

    params: w0 (F,H0), b0 (1,H0), w1 (H0,H1), b1 (1,H1), wc (H1,C), bc (1,C)
            — weights pre-transposed vs torch.nn.Linear.
    Returns bf16 MXU weights + f32 biases, ready to pass to the forward.
    """
    return dict(
        w0=jnp.asarray(params["w0"], jnp.bfloat16),
        w1=jnp.asarray(params["w1"], jnp.bfloat16),
        wc=jnp.asarray(params["wc"], jnp.bfloat16),
        b0=jnp.asarray(params["b0"], jnp.float32).reshape(1, -1),
        b1=jnp.asarray(params["b1"], jnp.float32).reshape(1, -1),
        bc=jnp.asarray(params["bc"], jnp.float32).reshape(1, -1),
    )


def autoencoder_classifier(x, prepared, *, batch_tile=None):
    """Forward pass of AutoEncoderClassifier.

    x: (B, F) float32 array.
    prepared: output of prepare_params().
    Returns (B, C) float32 log-probabilities.
    """
    B, F = x.shape
    w0, b0 = prepared["w0"], prepared["b0"]
    w1, b1 = prepared["w1"], prepared["b1"]
    wc, bc = prepared["wc"], prepared["bc"]
    H0, H1, C = w0.shape[1], w1.shape[1], wc.shape[1]

    tb = batch_tile if batch_tile is not None else _default_batch_tile(B)
    tb = min(tb, B)
    if tb != B:
        tb = max(8, (tb // 8) * 8)   # (8,128) rule on the f32 x / out blocks

    # Ragged batch: pad rows up to a multiple of tb so the grid never
    # collapses to 1 for awkward B (copy only happens in the ragged case).
    grid = (B + tb - 1) // tb
    Bp = grid * tb
    x_in = x if Bp == B else jnp.pad(x, ((0, Bp - B), (0, 0)))

    # Grid-invariant operands: VMEM-resident for the whole grid, single-buffered.
    def const(shape):
        return pl.BlockSpec(shape, lambda i: (0, 0),
                            pipeline_mode=pl.Buffered(1))

    bytes_accessed = (
        Bp * F * 4 + Bp * C * 4                       # x in, out
        + (F * H0 + H0 * H1 + H1 * C) * 2             # bf16 weights
        + (H0 + H1 + C) * 4)                          # f32 biases
    cost = pl.CostEstimate(
        flops=2 * Bp * (F * H0 + H0 * H1 + H1 * C),
        transcendentals=Bp * (H0 + H1 + C),
        bytes_accessed=bytes_accessed)

    grid_spec = pltpu.PrefetchScalarGridSpec(
        num_scalar_prefetch=0,
        grid=(grid,),
        in_specs=[
            pl.BlockSpec((tb, F), lambda i: (i, 0)),   # x tile over batch
            const((F, H0)), const((1, H0)),            # encoder layer 0
            const((H0, H1)), const((1, H1)),           # encoder layer 1
            const((H1, C)), const((1, C)),             # classifier
        ],
        out_specs=pl.BlockSpec((tb, C), lambda i: (i, 0)),
    )
    out = pl.pallas_call(
        _ae_classifier_kernel,
        out_shape=jax.ShapeDtypeStruct((Bp, C), jnp.float32),
        grid_spec=grid_spec,
        compiler_params=pltpu.CompilerParams(
            dimension_semantics=("parallel",)),
        cost_estimate=cost,
        # NOTE: VMEM footprint is tiny (<1 MiB resident weights + a few MiB of
        # double-buffered x/out at tb=1024). If hidden sizes ever scale up,
        # re-budget against v7x's 64 MiB and set vmem_limit_bytes explicitly.
    )(x_in, w0, b0, w1, b1, wc, bc)
    return out if Bp == B else out[:B]


# ----------------------------- references ----------------------------------

def _reference_f32(x, params):
    h = jax.nn.sigmoid(x @ params["w0"] + params["b0"])
    h = jax.nn.sigmoid(h @ params["w1"] + params["b1"])
    logits = h @ params["wc"] + params["bc"]
    return jax.nn.log_softmax(logits, axis=1)


def _reference_bf16(x, params):
    # Same bf16 casts / math as the kernel, for a tight numerical check.
    f32 = jnp.float32
    h = x.astype(jnp.bfloat16)
    z = jnp.dot(h, params["w0"].astype(jnp.bfloat16), preferred_element_type=f32)
    h = _sigmoid_tanh(z + params["b0"])
    z = jnp.dot(h.astype(jnp.bfloat16), params["w1"].astype(jnp.bfloat16),
                preferred_element_type=f32)
    h = _sigmoid_tanh(z + params["b1"])
    logits = jnp.dot(h.astype(jnp.bfloat16), params["wc"].astype(jnp.bfloat16),
                     preferred_element_type=f32) + params["bc"]
    return jax.nn.log_softmax(logits, axis=1)


def _init_linear(key, fan_in, fan_out):
    # PyTorch-style uniform(-1/sqrt(fan_in), 1/sqrt(fan_in)) init.
    kw, kb = jax.random.split(key)
    bound = 1.0 / jnp.sqrt(fan_in)
    w = jax.random.uniform(kw, (fan_in, fan_out), jnp.float32, -bound, bound)
    b = jax.random.uniform(kb, (1, fan_out), jnp.float32, -bound, bound)
    return w, b


if __name__ == "__main__":
    # feature_size=16, hidden_layer_sizes=[32, 32], num_classes=8.
    F, H0, H1, C = 16, 32, 32, 8

    key = jax.random.PRNGKey(0)
    kx, k0, k1, kc, kx2 = jax.random.split(key, 5)

    w0, b0 = _init_linear(k0, F, H0)
    w1, b1 = _init_linear(k1, H0, H1)
    wc, bc = _init_linear(kc, H1, C)
    params = dict(w0=w0, b0=b0, w1=w1, b1=b1, wc=wc, bc=bc)
    prepared = prepare_params(params)   # hoisted one-time weight prep

    # --- small batch (single-tile path) ---
    B = 8
    x = jax.random.normal(kx, (B, F), jnp.float32)
    out = jax.block_until_ready(autoencoder_classifier(x, prepared))
    assert out.shape == (B, C)
    assert bool(jnp.all(jnp.isfinite(out)))
    ref_bf16 = _reference_bf16(x, params)
    assert jnp.allclose(out, ref_bf16, atol=1e-3, rtol=1e-3), \
        "mismatch vs bf16-matched reference (small batch)"
    ref_f32 = _reference_f32(x, params)
    assert jnp.allclose(out, ref_f32, atol=5e-2, rtol=0.0), \
        "mismatch vs f32 reference (small batch)"

    # --- larger, ragged batch (multi-tile grid + padded-tail path) ---
    B2 = 200
    x2 = jax.random.normal(kx2, (B2, F), jnp.float32)
    out2 = jax.block_until_ready(autoencoder_classifier(x2, prepared))
    assert out2.shape == (B2, C)
    assert bool(jnp.all(jnp.isfinite(out2)))
    assert jnp.allclose(out2, _reference_bf16(x2, params), atol=1e-3, rtol=1e-3), \
        "mismatch vs bf16-matched reference (ragged batch)"
    assert jnp.allclose(out2, _reference_f32(x2, params), atol=5e-2, rtol=0.0), \
        "mismatch vs f32 reference (ragged batch)"

    print("KERNEL_OK")
</pallas_src>

<mosaic_0001>
module attributes {stable_mosaic.version = 11 : i64} {
  func.func @_ae_classifier_kernel(%arg0: i32, %arg1: memref<8x16xf32, #tpu.memory_space<vmem>>, %arg2: memref<16x32xbf16, #tpu.memory_space<vmem>>, %arg3: memref<1x32xf32, #tpu.memory_space<vmem>>, %arg4: memref<32x32xbf16, #tpu.memory_space<vmem>>, %arg5: memref<1x32xf32, #tpu.memory_space<vmem>>, %arg6: memref<32x8xbf16, #tpu.memory_space<vmem>>, %arg7: memref<1x8xf32, #tpu.memory_space<vmem>>, %arg8: memref<8x8xf32, #tpu.memory_space<vmem>>) attributes {dimension_semantics = [#tpu.dimension_semantics<parallel>], iteration_bounds = array<i64: 1>, scalar_prefetch = 0 : i64, scratch_operands = 0 : i64, tpu.core_type = #tpu.core_type<tc>, window_params = [{transform_indices = @transform_0, window_bounds = array<i64: 8, 16>}, {pipeline_mode = #tpu.pipeline_mode<synchronous>, transform_indices = @transform_1, window_bounds = array<i64: 16, 32>}, {pipeline_mode = #tpu.pipeline_mode<synchronous>, transform_indices = @transform_2, window_bounds = array<i64: 1, 32>}, {pipeline_mode = #tpu.pipeline_mode<synchronous>, transform_indices = @transform_3, window_bounds = array<i64: 32, 32>}, {pipeline_mode = #tpu.pipeline_mode<synchronous>, transform_indices = @transform_4, window_bounds = array<i64: 1, 32>}, {pipeline_mode = #tpu.pipeline_mode<synchronous>, transform_indices = @transform_5, window_bounds = array<i64: 32, 8>}, {pipeline_mode = #tpu.pipeline_mode<synchronous>, transform_indices = @transform_6, window_bounds = array<i64: 1, 8>}, {transform_indices = @transform_7, window_bounds = array<i64: 8, 8>}]} {
    %c0 = arith.constant 0 : index
    %c0_0 = arith.constant 0 : index
    %0 = vector.load %arg1[%c0, %c0_0] : memref<8x16xf32, #tpu.memory_space<vmem>>, vector<8x16xf32>
    %1 = arith.truncf %0 : vector<8x16xf32> to vector<8x16xbf16>
    %c0_1 = arith.constant 0 : index
    %c0_2 = arith.constant 0 : index
    %2 = vector.load %arg2[%c0_1, %c0_2] : memref<16x32xbf16, #tpu.memory_space<vmem>>, vector<16x32xbf16>
    %cst = arith.constant dense<0.000000e+00> : vector<8x32xf32>
    %3 = tpu.matmul %1, %2, %cst {dimension_numbers = #tpu.dot_dimension_numbers<[1], [0], [0], [1], [0, 0, 1, 1], [], []>} : vector<8x16xbf16>, vector<16x32xbf16>, vector<8x32xf32> -> vector<8x32xf32>
    %c0_3 = arith.constant 0 : index
    %c0_4 = arith.constant 0 : index
    %4 = vector.load %arg3[%c0_3, %c0_4] : memref<1x32xf32, #tpu.memory_space<vmem>>, vector<1x32xf32>
    %5 = vector.broadcast %4 : vector<1x32xf32> to vector<8x32xf32>
    %6 = arith.addf %3, %5 : vector<8x32xf32>
    %cst_5 = arith.constant 5.000000e-01 : f32
    %7 = vector.broadcast %cst_5 : f32 to vector<8x32xf32>
    %8 = arith.mulf %7, %6 : vector<8x32xf32>
    %9 = math.tanh %8 : vector<8x32xf32>
    %cst_6 = arith.constant 1.000000e+00 : f32
    %10 = vector.broadcast %cst_6 : f32 to vector<8x32xf32>
    %11 = arith.addf %9, %10 : vector<8x32xf32>
    %cst_7 = arith.constant 5.000000e-01 : f32
    %12 = vector.broadcast %cst_7 : f32 to vector<8x32xf32>
    %13 = arith.mulf %12, %11 : vector<8x32xf32>
    %14 = arith.truncf %13 : vector<8x32xf32> to vector<8x32xbf16>
    %c0_8 = arith.constant 0 : index
    %c0_9 = arith.constant 0 : index
    %15 = vector.load %arg4[%c0_8, %c0_9] : memref<32x32xbf16, #tpu.memory_space<vmem>>, vector<32x32xbf16>
    %cst_10 = arith.constant dense<0.000000e+00> : vector<8x32xf32>
    %16 = tpu.matmul %14, %15, %cst_10 {dimension_numbers = #tpu.dot_dimension_numbers<[1], [0], [0], [1], [0, 0, 1, 1], [], []>} : vector<8x32xbf16>, vector<32x32xbf16>, vector<8x32xf32> -> vector<8x32xf32>
    %c0_11 = arith.constant 0 : index
    %c0_12 = arith.constant 0 : index
    %17 = vector.load %arg5[%c0_11, %c0_12] : memref<1x32xf32, #tpu.memory_space<vmem>>, vector<1x32xf32>
    %18 = vector.broadcast %17 : vector<1x32xf32> to vector<8x32xf32>
    %19 = arith.addf %16, %18 : vector<8x32xf32>
    %cst_13 = arith.constant 5.000000e-01 : f32
    %20 = vector.broadcast %cst_13 : f32 to vector<8x32xf32>
    %21 = arith.mulf %20, %19 : vector<8x32xf32>
    %22 = math.tanh %21 : vector<8x32xf32>
    %cst_14 = arith.constant 1.000000e+00 : f32
    %23 = vector.broadcast %cst_14 : f32 to vector<8x32xf32>
    %24 = arith.addf %22, %23 : vector<8x32xf32>
    %cst_15 = arith.constant 5.000000e-01 : f32
    %25 = vector.broadcast %cst_15 : f32 to vector<8x32xf32>
    %26 = arith.mulf %25, %24 : vector<8x32xf32>
    %27 = arith.truncf %26 : vector<8x32xf32> to vector<8x32xbf16>
    %c0_16 = arith.constant 0 : index
    %c0_17 = arith.constant 0 : index
    %28 = vector.load %arg6[%c0_16, %c0_17] : memref<32x8xbf16, #tpu.memory_space<vmem>>, vector<32x8xbf16>
    %cst_18 = arith.constant dense<0.000000e+00> : vector<8x8xf32>
    %29 = tpu.matmul %27, %28, %cst_18 {dimension_numbers = #tpu.dot_dimension_numbers<[1], [0], [0], [1], [0, 0, 1, 1], [], []>} : vector<8x32xbf16>, vector<32x8xbf16>, vector<8x8xf32> -> vector<8x8xf32>
    %c0_19 = arith.constant 0 : index
    %c0_20 = arith.constant 0 : index
    %30 = vector.load %arg7[%c0_19, %c0_20] : memref<1x8xf32, #tpu.memory_space<vmem>>, vector<1x8xf32>
    %31 = vector.broadcast %30 : vector<1x8xf32> to vector<8x8xf32>
    %32 = arith.addf %29, %31 : vector<8x8xf32>
    %cst_21 = arith.constant dense<0xFF800000> : vector<8xf32>
    %33 = vector.multi_reduction <maximumf>, %32, %cst_21 [1] : vector<8x8xf32> to vector<8xf32>
    %34 = vector.shape_cast %33 : vector<8xf32> to vector<8x1xf32>
    %35 = vector.broadcast %34 : vector<8x1xf32> to vector<8x8xf32>
    %36 = arith.subf %32, %35 : vector<8x8xf32>
    %37 = math.exp %36 : vector<8x8xf32>
    %cst_22 = arith.constant dense<0.000000e+00> : vector<8xf32>
    %38 = vector.multi_reduction <add>, %37, %cst_22 [1] : vector<8x8xf32> to vector<8xf32>
    %39 = vector.shape_cast %38 : vector<8xf32> to vector<8x1xf32>
    %40 = math.log %39 : vector<8x1xf32>
    %41 = vector.broadcast %40 : vector<8x1xf32> to vector<8x8xf32>
    %42 = arith.subf %36, %41 : vector<8x8xf32>
    %c0_23 = arith.constant 0 : index
    %c0_24 = arith.constant 0 : index
    %43 = vector.load %arg8[%c0_23, %c0_24] : memref<8x8xf32, #tpu.memory_space<vmem>>, vector<8x8xf32>
    tpu.vector_store %arg8[%c0_23, %c0_24], %42 {strides = array<i32>} : memref<8x8xf32, #tpu.memory_space<vmem>>, vector<8x8xf32>,
    return
  }
  func.func @transform_0(%arg0: i32) -> (i32, i32) {
    %c0_i32 = arith.constant 0 : i32
    %c0_i32_0 = arith.constant 0 : i32
    return %arg0, %c0_i32 : i32, i32
  }
  func.func @transform_1(%arg0: i32) -> (i32, i32) {
    %c0_i32 = arith.constant 0 : i32
    %c0_i32_0 = arith.constant 0 : i32
    %c0_i32_1 = arith.constant 0 : i32
    return %c0_i32, %c0_i32_0 : i32, i32
  }
  func.func @transform_2(%arg0: i32) -> (i32, i32) {
    %c0_i32 = arith.constant 0 : i32
    %c0_i32_0 = arith.constant 0 : i32
    %c0_i32_1 = arith.constant 0 : i32
    return %c0_i32, %c0_i32_0 : i32, i32
  }
  func.func @transform_3(%arg0: i32) -> (i32, i32) {
    %c0_i32 = arith.constant 0 : i32
    %c0_i32_0 = arith.constant 0 : i32
    %c0_i32_1 = arith.constant 0 : i32
    return %c0_i32, %c0_i32_0 : i32, i32
  }
  func.func @transform_4(%arg0: i32) -> (i32, i32) {
    %c0_i32 = arith.constant 0 : i32
    %c0_i32_0 = arith.constant 0 : i32
    %c0_i32_1 = arith.constant 0 : i32
    return %c0_i32, %c0_i32_0 : i32, i32
  }
  func.func @transform_5(%arg0: i32) -> (i32, i32) {
    %c0_i32 = arith.constant 0 : i32
    %c0_i32_0 = arith.constant 0 : i32
    %c0_i32_1 = arith.constant 0 : i32
    return %c0_i32, %c0_i32_0 : i32, i32
  }
  func.func @transform_6(%arg0: i32) -> (i32, i32) {
    %c0_i32 = arith.constant 0 : i32
    %c0_i32_0 = arith.constant 0 : i32
    %c0_i32_1 = arith.constant 0 : i32
    return %c0_i32, %c0_i32_0 : i32, i32
  }
  func.func @transform_7(%arg0: i32) -> (i32, i32) {
    %c0_i32 = arith.constant 0 : i32
    %c0_i32_0 = arith.constant 0 : i32
    return %arg0, %c0_i32 : i32, i32
  }
}

</mosaic_0001>

<bundles_post_ra>
// kernel: tpu_custom_call.1
= control target key start
LH: loop header
LB: loop body
LE: loop exit
PB: predicated region body
PF: predicated region fallthrough
CT: control target
= control target key end

     0   :  { %12 = vsyncpa [#allocation3], 0  ;;  %s482_s0 = inlined_call_operand.vmem [shape: f32[8,16], index: 0, kind: input, shape index: {}]   ;;  %s483_s1 = inlined_call_operand.hbm [shape: bf16[16,32], index: 1, kind: input, shape index: {}]   ;;  %s484_s2 = inlined_call_operand.vmem [shape: f32[1,32], index: 2, kind: input, shape index: {}]   ;;  %s485_s3 = inlined_call_operand.vmem [shape: bf16[32,32], index: 3, kind: input, shape index: {}]   ;;  %s486_s4 = inlined_call_operand.vmem [shape: f32[1,32], index: 4, kind: input, shape index: {}]   ;;  %s487_s5 = inlined_call_operand.vmem [shape: bf16[32,8], index: 5, kind: input, shape index: {}]   ;;  %s488_s6 = inlined_call_operand.vmem [shape: f32[1,8], index: 6, kind: input, shape index: {}]   ;;  %s489_s7 = inlined_call_operand.hbm [shape: f32[8,8], index: 7, kind: output, shape index: {}]  }
   0x1   :  { %13 = vsyncpa [#allocation4], 0  ;;  %s383_s24 = smov [#allocation2]   ;;  %s335_s28 = scalar_lea.hbm %s483_s1, 128 }
   0x2   :  { %s21_s25 = sshll.u32 %s383_s24, 4  ;;  %p336_p0 = scmp.ne.s32.totalorder %s483_s1, %s335_s28  ;;  %s22_s25 = int_to_ptr.vmem [resolvable:$true] %s21_s25 }
   0x3   :  { %p339_p1 = scmp.lt.u32.totalorder %s335_s28, %s483_s1 }
   0x5   :  { %p341_p2 = pnand %p339_p1, %p336_p0 }
   0x7   :  { %344 = shalt.err (!%p341_p2)
}
   0x8   :  { %s345_s10 = scalar_lea.vmem %s22_s25, 128  ;;  %p350_p4 = scmp.lt.s32.totalorder %s22_s25, %s22_s25 }
   0x9   :  { %p346_p3 = scmp.ne.s32.totalorder %s22_s25, %s345_s10  ;;  %p351_p5 = scmp.lt.s32.totalorder %s345_s10, %s345_s10 }
   0xb   :  { %p352_p6 = por %p351_p5, %p350_p4 }
   0xd   :  { %p353_p7 = pnand %p352_p6, %p346_p3 }
   0xf   :  { %356 = shalt.err (!%p353_p7)
}
  0x10   :  { %s384_s11 = smov 64   ;;  %s385_s12 = smov 4  }
  0x11   :  { %27 = dma.hbm_to_vmem [thread:$0]  %s483_s1, 128, %s22_s25, [#allocation3], %s384_s11, %s384_s11, %s385_s12  }
  0x12   :  { %379 = dma.done.wait [#allocation3], 128  }
  0x13   :  { %380 = vsyncadd [#allocation3], 4294967168  ;;  %v386_v0 = vmov 0.0   ;;  %vm387_vm0 = vmmov 0   ;;  %v322_v1 = vld [vmem:[#allocation2] sm:$0xff]   ;;  %vm59_vm1 = vcmask 130048  }
  0x14   :  { %294 = vmatprep.subr.bf16.mxu0 %v386_v0  ;;  %296 = vmatprep.mubr.msk.bf16.mxu0 %vm387_vm0, %v386_v0  ;;  %v42_v2 = vld [vmem:[%s482_s0] sm:$0xff]  ;;  %v324_v5 = vld [vmem:[%s485_s3 + $0x8] sm:$0xff]   ;;  %vm131_vm2 = vcmask 261120   ;;  %vm246_vm3 = vcmask 64512  }
  0x15   :  { %300 = vmatprep.subr.bf16.mxu1 %v386_v0  ;;  %304 = vmatprep.mubr.msk.bf16.mxu1 %vm387_vm0, %v386_v0  ;;  %v43_v3 = vpack.c.bf16 %v42_v2, %v42_v2  ;;  %v323_v4 = vld [vmem:[%s485_s3] sm:$0xff]   ;;  %v326_v18 = vld [vmem:[%s487_s5 + $0x8] sm:$0xff]  }
  0x16   :  { %295 = vmatpush3.bf16.msra.mxu0 %v322_v1  ;;  %301 = vmatpush3.bf16.msra.mxu1 %v323_v4  ;;  %v275_v6 = vld [vmem:[%s484_s2] ss:$0 sm:$0xff] }
  0x17   :  { %308 = vmatprep.subr.bf16.mxu0 %v386_v0  ;;  %302 = vmatprep.subr.bf16.mxu1 %v386_v0  ;;  %v325_v17 = vld [vmem:[%s487_s5] sm:$0xff]  }
  0x18   :  { %v278_v19 = vld [vmem:[%s486_s4] ss:$0 sm:$0xff]  ;;  %s388_s4 = smov [#allocation5]  }
  0x19   :  { %297 = vmatmul.mubr.msk.bf16.vlgmr.msra.gmra.mrb[0].mxu0 %vm59_vm1, %v43_v3  ;;  %v282_v30 = vld [vmem:[%s488_s6] ss:$0 sm:$0xff]  ;;  %s266_s6 = sshll.u32 %s388_s4, 4  ;;  %s267_s6 = int_to_ptr.vmem [resolvable:$true] %s266_s6 }
  0x1a   :  { %312 = vmatprep.mubr.msk.bf16.mxu0 %vm387_vm0, %v386_v0  ;;  %303 = vmatpush3.bf16.msra.mxu1 %v324_v5  ;;  %s357_s26 = scalar_lea.vmem %s267_s6, 128  ;;  %p362_p9 = scmp.lt.s32.totalorder %s267_s6, %s267_s6 }
  0x1b   :  { %309 = vmatpush3.bf16.msra.mxu0 %v325_v17  ;;  %p358_p8 = scmp.ne.s32.totalorder %s267_s6, %s357_s26  ;;  %p363_p10 = scmp.lt.s32.totalorder %s357_s26, %s357_s26 }
  0x1c   :  { %310 = vmatprep.subr.bf16.mxu0 %v386_v0 }
  0x1d   :  { %p364_p11 = por %p363_p10, %p362_p9 }
  0x1f   :  { %311 = vmatpush3.bf16.msra.mxu0 %v326_v18  ;;  %p365_p12 = pnand %p364_p11, %p358_p8 }
  0xec   :  { %v97_v7 = vpop.f32.mrb[0].mxu0 }
  0xed   :  { %v98_v8 = vadd.f32 %v275_v6, %v97_v7  ;;  %v298_v9 = vpop.f32.mrb[1].mxu0 }
  0xee   :  { %v100_v10 = vpop.f32.mrb[2].mxu0 }
  0xef   :  { %v103_v11 = vmul.f32 0.5, %v98_v8  ;;  %v299_v12 = vpop.f32.mrb[3].mxu0 }
  0xf1   :  { %327 = vtanh.f32 %v103_v11 }
  0xfb   :  { %v328_v13 = vpop.eup %327 }
  0xfc   :  { %v105_v14 = vadd.f32 1.0, %v328_v13 }
  0xfe   :  { %v106_v15 = vmul.f32 0.5, %v105_v14 }
 0x100   :  { %v107_v16 = vpack.c.bf16 %v106_v15, %v106_v15 }
 0x102   :  { %305 = vmatmul.mubr.msk.bf16.vlgmr.msra.gmra.mrb[0].mxu1 %vm131_vm2, %v107_v16 }
 0x1d5   :  { %v169_v20 = vpop.f32.mrb[0].mxu1 }
 0x1d6   :  { %v170_v21 = vadd.f32 %v278_v19, %v169_v20  ;;  %v306_v22 = vpop.f32.mrb[1].mxu1 }
 0x1d7   :  { %v172_v23 = vpop.f32.mrb[2].mxu1 }
 0x1d8   :  { %v175_v24 = vmul.f32 0.5, %v170_v21  ;;  %v307_v25 = vpop.f32.mrb[3].mxu1 }
 0x1da   :  { %329 = vtanh.f32 %v175_v24 }
 0x1e4   :  { %v330_v26 = vpop.eup %329 }
 0x1e5   :  { %v177_v27 = vadd.f32 1.0, %v330_v26 }
 0x1e7   :  { %v178_v28 = vmul.f32 0.5, %v177_v27 }
 0x1e9   :  { %v179_v29 = vpack.c.bf16 %v178_v28, %v178_v28 }
 0x1eb   :  { %313 = vmatmul.mubr.msk.bf16.vlgmr.msra.gmra.mrb[4].mxu0 %vm131_vm2, %v179_v29 }
 0x2be   :  { %v240_v31 = vpop.f32.mrb[4].mxu0 }
 0x2bf   :  { %v241_v32 = vadd.f32 %v282_v30, %v240_v31  ;;  %v314_v33 = vpop.f32.mrb[5].mxu0 }
 0x2c0   :  { %v243_v34 = vpop.f32.mrb[6].mxu0 }
 0x2c1   :  { %v315_v35 = vpop.f32.mrb[7].mxu0  ;;  %v247_v36 = vsel %vm246_vm3, %v241_v32, -inf }
 0x2c2   :  { %248 = vmax.xlane.f32.xlu0 %v247_v36 }
 0x34f   :  { %v249_v37 = vpop.xlane.xlu0 %248 }
 0x350   :  { %v250_v38 = vsub.f32 %v241_v32, %v249_v37 }
 0x352   :  { %v251_v39 = vmul.f32 1.442695, %v250_v38 }
 0x354   :  { %331 = vpow2.f32 %v251_v39 }
 0x35e   :  { %v332_v40 = vpop.eup %331 }
 0x35f   :  { %v253_v41 = vsel %vm246_vm3, %v332_v40, 0.0 }
 0x360   :  { %254 = vadd.xlane.f32.xlu0 %v253_v41 }
 0x3ed   :  { %v255_v42 = vpop.xlane.xlu0 %254 }
 0x3ee   :  { %333 = vlog2.f32 %v255_v42 }
 0x3f8   :  { %v334_v43 = vpop.eup %333 }
 0x3f9   :  { %v257_v44 = vmul.f32 0.6931472, %v334_v43 }
 0x3fb   :  { %v258_v45 = vsub.f32 %v250_v38, %v257_v44 }
 0x3fd   :  { %259 = vst.msk [vmem:[#allocation5] sm:$0xff] %vm246_vm3, %v258_v45 }
 0x3fe   :  { %368 = shalt.err (!%p365_p12)
}
 0x3ff   :  { %s369_s29 = scalar_lea.hbm %s489_s7, 128 }
 0x400   :  { %p370_p13 = scmp.ne.s32.totalorder %s489_s7, %s369_s29  ;;  %p373_p0 = scmp.lt.u32.totalorder %s369_s29, %s489_s7 }
 0x402   :  { %p375_p1 = pnand %p373_p0, %p370_p13 }
 0x404   :  { %378 = shalt.err (!%p375_p1)
}
 0x405   :  { %269 = dma.vmem_to_hbm [thread:$0]  %s267_s6, 128, %s489_s7, [#allocation4]  }
 0x406   :  { %381 = dma.done.wait [#allocation4], 128  }
 0x407   :  { %382 = vsyncadd [#allocation4], 4294967168 }
 0x408   :  { %273 = vsyncpa [#allocation3], 1 }
 0x409   :  { %274 = vsyncpa [#allocation4], 1 }

</bundles_post_ra>
